<compile_context>
chip_gen: v7x
topology: tpu7x:2x2x1
jax: 0.10.0
libtpu: 0.0.40
codegen_flags: <defaults>
</compile_context>

<pallas_src>
import functools
from typing import NamedTuple

import numpy as np

import jax
import jax.numpy as jnp
from jax import lax
from jax.experimental import pallas as pl
from jax.experimental.pallas import tpu as pltpu


# ----------------------------------------------------------------------------
# Static per-layer configuration.
# ----------------------------------------------------------------------------
class _LayerStatic(NamedTuple):
    cin: int
    cout: int
    cinp: int          # cin padded to a sublane multiple (8)
    coutp: int         # cout padded to a sublane multiple (8)
    kh: int
    kw: int
    stride: int
    pad: int
    h_in: int
    w_in: int
    h_out: int
    w_out: int
    m_in: int          # h_in * w_in
    m_out: int         # h_out * w_out
    needs_ds: bool     # strided / cropped conv -> one one-hot downsample matmul


def _round8(v):
    return -(-v // 8) * 8


def _conv_out_size(size, k, stride, pad):
    return (size + 2 * pad - k) // stride + 1


def _build_statics(n_input_channels, h, w, layer_cfgs):
    statics = []
    cin = n_input_channels
    for cfg in layer_cfgs:
        cout = cfg["out_channels"]
        k = cfg["kernel_size"]
        stride = cfg.get("stride", 1)
        pad = cfg.get("padding", 0)
        h_out = _conv_out_size(h, k, stride, pad)
        w_out = _conv_out_size(w, k, stride, pad)
        needs_ds = not (stride == 1 and h_out == h and w_out == w)
        if needs_ds and ((h_out - 1) * stride >= h or (w_out - 1) * stride >= w):
            # TODO(synk): padding >= kernel extent would need an explicitly
            # zero-padded activation buffer; not reachable from SimpleCNN's
            # usual configs.
            raise NotImplementedError("padding >= kernel size not supported")
        statics.append(_LayerStatic(
            cin=cin, cout=cout, cinp=_round8(cin), coutp=_round8(cout),
            kh=k, kw=k, stride=stride, pad=pad,
            h_in=h, w_in=w, h_out=h_out, w_out=w_out,
            m_in=h * w, m_out=h_out * w_out, needs_ds=needs_ds))
        cin, h, w = cout, h_out, w_out
    return statics


# ----------------------------------------------------------------------------
# Trace-time (numpy) helpers: per-tap border masks and the one-hot
# downsample/crop matrix used by strided layers.
# ----------------------------------------------------------------------------
def _build_tap_masks(st, nb):
    """(T, 1, nb*m_in) 0/1 masks: valid source positions for each tap of the
    full-resolution stride-1 windowed sum, tiled over the nb lane-folded
    images (also zeroes the roll wrap across image boundaries)."""
    taps = st.kh * st.kw
    m = np.zeros((taps, 1, nb * st.m_in), np.float32)
    hh = np.arange(st.h_in)[:, None]
    ww = np.arange(st.w_in)[None, :]
    for t in range(taps):
        i, j = divmod(t, st.kw)
        hs = hh + i - st.pad
        ws = ww + j - st.pad
        valid = (hs >= 0) & (hs < st.h_in) & (ws >= 0) & (ws < st.w_in)
        m[t, 0, :] = np.tile(valid.astype(np.float32).reshape(-1), nb)
    return m


def _build_downsample(st, nb):
    """(nb*m_in, nb*m_out) one-hot matrix selecting output[ho,wo] =
    full_res[ho*stride, wo*stride] per lane-folded image (block diagonal)."""
    d = np.zeros((nb * st.m_in, nb * st.m_out), np.float32)
    ho = np.arange(st.h_out)[:, None]
    wo = np.arange(st.w_out)[None, :]
    src = (ho * st.stride * st.w_in + wo * st.stride).reshape(-1)
    dst = np.arange(st.m_out)
    for img in range(nb):
        d[img * st.m_in + src, img * st.m_out + dst] = 1.0
    return d


# ----------------------------------------------------------------------------
# Fused Pallas kernel: all conv layers, one grid step per batch group.
# ----------------------------------------------------------------------------
def _make_fused_kernel(statics, nb):
    n_layers = len(statics)

    def kernel(x_ref, *refs):
        o_ref = refs[-1]
        prm = refs[:-1]
        a = x_ref[0]                                   # (Cin_pad, NB*H*W), f32
        r = 0
        for li, st in enumerate(statics):
            w_ref, b_ref, m_ref = prm[r], prm[r + 1], prm[r + 2]
            r += 3
            if st.needs_ds:
                d_ref = prm[r]
                r += 1
            lanes = nb * st.m_in
            # In-VMEM im2col: each tap is a static XLU lane rotation of the
            # (C, NB*H*W) activation, zeroed at borders by a 0/1 mask (f32).
            taps = []
            for t in range(st.kh * st.kw):
                i, j = divmod(t, st.kw)
                off = (i - st.pad) * st.w_in + (j - st.pad)
                shift = (-off) % lanes                 # result[d] = a[d + off]
                rolled = a if shift == 0 else pltpu.roll(a, shift=shift, axis=1)
                taps.append(rolled * m_ref[t])
            # ONE fused MXU matmul per layer:
            # (Cout_pad, T*Cin_pad) @ (T*Cin_pad, NB*H*W), f32 accumulate.
            stacked = jnp.concatenate(taps, axis=0).astype(jnp.bfloat16)
            conv = jnp.dot(w_ref[...], stacked,
                           preferred_element_type=jnp.float32)
            if st.needs_ds:
                # Strided / valid conv: one one-hot downsample matmul (exact
                # column selection) instead of per-tap gathers.
                conv = jnp.dot(conv.astype(jnp.bfloat16), d_ref[...],
                               preferred_element_type=jnp.float32)
            act = jnp.maximum(conv + b_ref[...], 0.0)  # bias + ReLU in f32
            if li == n_layers - 1:
                o_ref[0] = act.astype(o_ref.dtype)     # NCHW-flatten order
            else:
                a = act                                # stays in VMEM, f32

    return kernel


# ----------------------------------------------------------------------------
# Grid sizing: fold batch into lanes, keep 2-way grid on dual-TC chips.
# ----------------------------------------------------------------------------
def _is_v7x():
    try:
        kind = jax.devices()[0].device_kind.lower()
    except Exception:
        return False
    return "v7" in kind or "7x" in kind


def _choose_num_groups(n, m_in):
    nb_cap = max(1, 4096 // max(m_in, 1))       # keep lane width modest
    min_groups = 2 if _is_v7x() else 1          # v7x: 2 TensorCores per chip
    for g in range(min(min_groups, n), n + 1):
        if n % g == 0 and n // g <= nb_cap:
            return g
    return n


# ----------------------------------------------------------------------------
# Forward pass: one pallas_call for the whole SimpleCNN.
# ----------------------------------------------------------------------------
def simple_cnn_forward(x_nchw, params, layer_cfgs):
    n, c0, h0, w0 = x_nchw.shape
    statics = _build_statics(c0, h0, w0, layer_cfgs)
    first, last = statics[0], statics[-1]

    groups = _choose_num_groups(n, h0 * w0)
    nb = n // groups
    lanes0 = nb * h0 * w0

    # NCHW -> (G, Cin_pad, NB*H*W): NB images folded into the lane dimension;
    # channel dim zero-padded to a sublane multiple (aligned tap stacking).
    x_p = jnp.pad(x_nchw.astype(jnp.float32),
                  ((0, 0), (0, first.cinp - c0), (0, 0), (0, 0)))
    x_lanes = jnp.transpose(
        x_p.reshape(groups, nb, first.cinp, h0 * w0),
        (0, 2, 1, 3)).reshape(groups, first.cinp, lanes0)

    args = [x_lanes]
    in_specs = [pl.BlockSpec((1, first.cinp, lanes0), lambda g: (g, 0, 0))]
    flops = 0
    for (w_oihw, bias), st in zip(params, statics):
        taps = st.kh * st.kw
        lanes_in = nb * st.m_in
        lanes_out = nb * st.m_out
        # OIHW -> (Cout_pad, T*Cin_pad), tap-major: matches the in-kernel
        # stacking order; bf16 for the MXU.
        w_t = jnp.transpose(w_oihw, (2, 3, 0, 1)).reshape(taps, st.cout, st.cin)
        w_t = jnp.pad(w_t, ((0, 0), (0, st.coutp - st.cout),
                            (0, st.cinp - st.cin)))
        w_fused = jnp.transpose(w_t, (1, 0, 2)).reshape(
            st.coutp, taps * st.cinp).astype(jnp.bfloat16)
        b_col = jnp.pad(bias, (0, st.coutp - st.cout)).reshape(
            st.coutp, 1).astype(jnp.float32)
        mask = jnp.asarray(_build_tap_masks(st, nb), jnp.float32)
        args += [w_fused, b_col, mask]
        in_specs += [
            pl.BlockSpec((st.coutp, taps * st.cinp), lambda g: (0, 0)),
            pl.BlockSpec((st.coutp, 1), lambda g: (0, 0)),
            pl.BlockSpec((taps, 1, lanes_in), lambda g: (0, 0, 0)),
        ]
        flops += 2 * st.coutp * taps * st.cinp * lanes_in
        if st.needs_ds:
            dmat = jnp.asarray(_build_downsample(st, nb), jnp.bfloat16)
            args.append(dmat)
            in_specs.append(pl.BlockSpec((lanes_in, lanes_out),
                                         lambda g: (0, 0)))
            flops += 2 * st.coutp * lanes_in * lanes_out

    lanes_last = nb * last.m_out
    out_shape = jax.ShapeDtypeStruct((groups, last.coutp, lanes_last),
                                     jnp.float32)
    out_specs = pl.BlockSpec((1, last.coutp, lanes_last), lambda g: (g, 0, 0))

    bytes_accessed = sum(int(np.prod(a_.shape)) * a_.dtype.itemsize
                         for a_ in args)
    bytes_accessed += int(np.prod(out_shape.shape)) * 4

    out = pl.pallas_call(
        _make_fused_kernel(statics, nb),
        out_shape=out_shape,
        grid_spec=pltpu.PrefetchScalarGridSpec(
            num_scalar_prefetch=0,
            grid=(groups,),
            in_specs=in_specs,
            out_specs=out_specs,
        ),
        compiler_params=pltpu.CompilerParams(
            dimension_semantics=("parallel",)),
        cost_estimate=pl.CostEstimate(
            flops=groups * flops, transcendentals=0,
            bytes_accessed=bytes_accessed),
    )(*args)

    # (G, Cout_pad, NB, M) -> (N, Cout*M): identical to PyTorch NCHW Flatten.
    out = out.reshape(groups, last.coutp, nb, last.m_out)
    out = jnp.transpose(out, (0, 2, 1, 3))[:, :, :last.cout, :]
    return out.reshape(n, last.cout * last.m_out)


# ----------------------------------------------------------------------------
# Parameter init (PyTorch-style OIHW weights) and pure-JAX reference.
# ----------------------------------------------------------------------------
def init_params(key, n_input_channels, layer_cfgs):
    params = []
    cin = n_input_channels
    for cfg in layer_cfgs:
        cout, k = cfg["out_channels"], cfg["kernel_size"]
        key, kw_, kb_ = jax.random.split(key, 3)
        fan_in = cin * k * k
        w = jax.random.normal(kw_, (cout, cin, k, k), jnp.float32) / jnp.sqrt(fan_in)
        b = 0.01 * jax.random.normal(kb_, (cout,), jnp.float32)
        params.append((w, b))
        cin = cout
    return params


def _reference_forward(x_nchw, params, layer_cfgs):
    x = x_nchw
    for (w, b), cfg in zip(params, layer_cfgs):
        s, p = cfg.get("stride", 1), cfg.get("padding", 0)
        x = lax.conv_general_dilated(
            x, w, window_strides=(s, s), padding=[(p, p), (p, p)],
            dimension_numbers=("NCHW", "OIHW", "NCHW"))
        x = jnp.maximum(x + b[None, :, None, None], 0.0)
    return x.reshape(x.shape[0], -1)


if __name__ == "__main__":
    key = jax.random.PRNGKey(0)
    k_in, k_par = jax.random.split(key)

    n_input_channels = 4
    layer_cfgs = [
        {"out_channels": 8, "kernel_size": 3, "stride": 1, "padding": 1},
        {"out_channels": 16, "kernel_size": 3, "stride": 2, "padding": 1},
    ]

    x = jax.random.normal(k_in, (2, 4, 16, 16), jnp.float32)   # NCHW like PyTorch
    params = init_params(k_par, n_input_channels, layer_cfgs)

    fwd = jax.jit(functools.partial(simple_cnn_forward, layer_cfgs=layer_cfgs))
    out = fwd(x, params)
    jax.block_until_ready(out)

    ref = _reference_forward(x, params, layer_cfgs)
    assert out.shape == (2, 16 * 8 * 8), out.shape
    # bf16 MXU operands (f32 accumulation) => relaxed tolerance vs f32 reference.
    assert jnp.allclose(out, ref, atol=5e-2, rtol=5e-2), \
        float(jnp.max(jnp.abs(out - ref)))

    print("KERNEL_OK")
</pallas_src>

<mosaic_0001>
module attributes {stable_mosaic.version = 11 : i64} {
  func.func @kernel(%arg0: i32, %arg1: memref<1x8x512xf32, #tpu.memory_space<vmem>>, %arg2: memref<8x72xbf16, #tpu.memory_space<vmem>>, %arg3: memref<8x1xf32, #tpu.memory_space<vmem>>, %arg4: memref<9x1x512xf32, #tpu.memory_space<vmem>>, %arg5: memref<16x72xbf16, #tpu.memory_space<vmem>>, %arg6: memref<16x1xf32, #tpu.memory_space<vmem>>, %arg7: memref<9x1x512xf32, #tpu.memory_space<vmem>>, %arg8: memref<512x128xbf16, #tpu.memory_space<vmem>>, %arg9: memref<1x16x128xf32, #tpu.memory_space<vmem>>) attributes {dimension_semantics = [#tpu.dimension_semantics<parallel>], iteration_bounds = array<i64: 1>, scalar_prefetch = 0 : i64, scratch_operands = 0 : i64, tpu.core_type = #tpu.core_type<tc>, window_params = [{transform_indices = @transform_0, window_bounds = array<i64: 1, 8, 512>}, {pipeline_mode = #tpu.pipeline_mode<synchronous>, transform_indices = @transform_1, window_bounds = array<i64: 8, 72>}, {pipeline_mode = #tpu.pipeline_mode<synchronous>, transform_indices = @transform_2, window_bounds = array<i64: 8, 1>}, {pipeline_mode = #tpu.pipeline_mode<synchronous>, transform_indices = @transform_3, window_bounds = array<i64: 9, 1, 512>}, {pipeline_mode = #tpu.pipeline_mode<synchronous>, transform_indices = @transform_4, window_bounds = array<i64: 16, 72>}, {pipeline_mode = #tpu.pipeline_mode<synchronous>, transform_indices = @transform_5, window_bounds = array<i64: 16, 1>}, {pipeline_mode = #tpu.pipeline_mode<synchronous>, transform_indices = @transform_6, window_bounds = array<i64: 9, 1, 512>}, {pipeline_mode = #tpu.pipeline_mode<synchronous>, transform_indices = @transform_7, window_bounds = array<i64: 512, 128>}, {transform_indices = @transform_8, window_bounds = array<i64: 1, 16, 128>}]} {
    %c0 = arith.constant 0 : index
    %c0_0 = arith.constant 0 : index
    %c0_1 = arith.constant 0 : index
    %0 = vector.load %arg1[%c0, %c0_0, %c0_1] : memref<1x8x512xf32, #tpu.memory_space<vmem>>, vector<1x8x512xf32>
    %1 = vector.shape_cast %0 : vector<1x8x512xf32> to vector<8x512xf32>
    %c17_i32 = arith.constant 17 : i32
    %2 = tpu.dynamic_rotate %1 by %c17_i32 dim 1 : vector<8x512xf32>, i32 -> vector<8x512xf32>
    %c0_2 = arith.constant 0 : index
    %c0_3 = arith.constant 0 : index
    %c0_4 = arith.constant 0 : index
    %3 = vector.load %arg4[%c0_2, %c0_3, %c0_4] : memref<9x1x512xf32, #tpu.memory_space<vmem>>, vector<1x1x512xf32>
    %4 = vector.shape_cast %3 : vector<1x1x512xf32> to vector<1x512xf32>
    %5 = vector.broadcast %4 : vector<1x512xf32> to vector<8x512xf32>
    %6 = arith.mulf %2, %5 : vector<8x512xf32>
    %c16_i32 = arith.constant 16 : i32
    %7 = tpu.dynamic_rotate %1 by %c16_i32 dim 1 : vector<8x512xf32>, i32 -> vector<8x512xf32>
    %c1 = arith.constant 1 : index
    %c0_5 = arith.constant 0 : index
    %c0_6 = arith.constant 0 : index
    %8 = vector.load %arg4[%c1, %c0_5, %c0_6] : memref<9x1x512xf32, #tpu.memory_space<vmem>>, vector<1x1x512xf32>
    %9 = vector.shape_cast %8 : vector<1x1x512xf32> to vector<1x512xf32>
    %10 = vector.broadcast %9 : vector<1x512xf32> to vector<8x512xf32>
    %11 = arith.mulf %7, %10 : vector<8x512xf32>
    %c15_i32 = arith.constant 15 : i32
    %12 = tpu.dynamic_rotate %1 by %c15_i32 dim 1 : vector<8x512xf32>, i32 -> vector<8x512xf32>
    %c2 = arith.constant 2 : index
    %c0_7 = arith.constant 0 : index
    %c0_8 = arith.constant 0 : index
    %13 = vector.load %arg4[%c2, %c0_7, %c0_8] : memref<9x1x512xf32, #tpu.memory_space<vmem>>, vector<1x1x512xf32>
    %14 = vector.shape_cast %13 : vector<1x1x512xf32> to vector<1x512xf32>
    %15 = vector.broadcast %14 : vector<1x512xf32> to vector<8x512xf32>
    %16 = arith.mulf %12, %15 : vector<8x512xf32>
    %c1_i32 = arith.constant 1 : i32
    %17 = tpu.dynamic_rotate %1 by %c1_i32 dim 1 : vector<8x512xf32>, i32 -> vector<8x512xf32>
    %c3 = arith.constant 3 : index
    %c0_9 = arith.constant 0 : index
    %c0_10 = arith.constant 0 : index
    %18 = vector.load %arg4[%c3, %c0_9, %c0_10] : memref<9x1x512xf32, #tpu.memory_space<vmem>>, vector<1x1x512xf32>
    %19 = vector.shape_cast %18 : vector<1x1x512xf32> to vector<1x512xf32>
    %20 = vector.broadcast %19 : vector<1x512xf32> to vector<8x512xf32>
    %21 = arith.mulf %17, %20 : vector<8x512xf32>
    %c4 = arith.constant 4 : index
    %c0_11 = arith.constant 0 : index
    %c0_12 = arith.constant 0 : index
    %22 = vector.load %arg4[%c4, %c0_11, %c0_12] : memref<9x1x512xf32, #tpu.memory_space<vmem>>, vector<1x1x512xf32>
    %23 = vector.shape_cast %22 : vector<1x1x512xf32> to vector<1x512xf32>
    %24 = vector.broadcast %23 : vector<1x512xf32> to vector<8x512xf32>
    %25 = arith.mulf %1, %24 : vector<8x512xf32>
    %c511_i32 = arith.constant 511 : i32
    %26 = tpu.dynamic_rotate %1 by %c511_i32 dim 1 : vector<8x512xf32>, i32 -> vector<8x512xf32>
    %c5 = arith.constant 5 : index
    %c0_13 = arith.constant 0 : index
    %c0_14 = arith.constant 0 : index
    %27 = vector.load %arg4[%c5, %c0_13, %c0_14] : memref<9x1x512xf32, #tpu.memory_space<vmem>>, vector<1x1x512xf32>
    %28 = vector.shape_cast %27 : vector<1x1x512xf32> to vector<1x512xf32>
    %29 = vector.broadcast %28 : vector<1x512xf32> to vector<8x512xf32>
    %30 = arith.mulf %26, %29 : vector<8x512xf32>
    %c497_i32 = arith.constant 497 : i32
    %31 = tpu.dynamic_rotate %1 by %c497_i32 dim 1 : vector<8x512xf32>, i32 -> vector<8x512xf32>
    %c6 = arith.constant 6 : index
    %c0_15 = arith.constant 0 : index
    %c0_16 = arith.constant 0 : index
    %32 = vector.load %arg4[%c6, %c0_15, %c0_16] : memref<9x1x512xf32, #tpu.memory_space<vmem>>, vector<1x1x512xf32>
    %33 = vector.shape_cast %32 : vector<1x1x512xf32> to vector<1x512xf32>
    %34 = vector.broadcast %33 : vector<1x512xf32> to vector<8x512xf32>
    %35 = arith.mulf %31, %34 : vector<8x512xf32>
    %c496_i32 = arith.constant 496 : i32
    %36 = tpu.dynamic_rotate %1 by %c496_i32 dim 1 : vector<8x512xf32>, i32 -> vector<8x512xf32>
    %c7 = arith.constant 7 : index
    %c0_17 = arith.constant 0 : index
    %c0_18 = arith.constant 0 : index
    %37 = vector.load %arg4[%c7, %c0_17, %c0_18] : memref<9x1x512xf32, #tpu.memory_space<vmem>>, vector<1x1x512xf32>
    %38 = vector.shape_cast %37 : vector<1x1x512xf32> to vector<1x512xf32>
    %39 = vector.broadcast %38 : vector<1x512xf32> to vector<8x512xf32>
    %40 = arith.mulf %36, %39 : vector<8x512xf32>
    %c495_i32 = arith.constant 495 : i32
    %41 = tpu.dynamic_rotate %1 by %c495_i32 dim 1 : vector<8x512xf32>, i32 -> vector<8x512xf32>
    %c8 = arith.constant 8 : index
    %c0_19 = arith.constant 0 : index
    %c0_20 = arith.constant 0 : index
    %42 = vector.load %arg4[%c8, %c0_19, %c0_20] : memref<9x1x512xf32, #tpu.memory_space<vmem>>, vector<1x1x512xf32>
    %43 = vector.shape_cast %42 : vector<1x1x512xf32> to vector<1x512xf32>
    %44 = vector.broadcast %43 : vector<1x512xf32> to vector<8x512xf32>
    %45 = arith.mulf %41, %44 : vector<8x512xf32>
    %46 = tpu.concatenate %6, %11, %16, %21, %25, %30, %35, %40, %45 in 0 : vector<8x512xf32>, vector<8x512xf32>, vector<8x512xf32>, vector<8x512xf32>, vector<8x512xf32>, vector<8x512xf32>, vector<8x512xf32>, vector<8x512xf32>, vector<8x512xf32> -> vector<72x512xf32>
    %47 = arith.truncf %46 : vector<72x512xf32> to vector<72x512xbf16>
    %c0_21 = arith.constant 0 : index
    %c0_22 = arith.constant 0 : index
    %48 = vector.load %arg2[%c0_21, %c0_22] : memref<8x72xbf16, #tpu.memory_space<vmem>>, vector<8x72xbf16>
    %cst = arith.constant dense<0.000000e+00> : vector<8x512xf32>
    %49 = tpu.matmul %48, %47, %cst {dimension_numbers = #tpu.dot_dimension_numbers<[1], [0], [0], [1], [0, 0, 1, 1], [], []>} : vector<8x72xbf16>, vector<72x512xbf16>, vector<8x512xf32> -> vector<8x512xf32>
    %c0_23 = arith.constant 0 : index
    %c0_24 = arith.constant 0 : index
    %50 = vector.load %arg3[%c0_23, %c0_24] : memref<8x1xf32, #tpu.memory_space<vmem>>, vector<8x1xf32>
    %51 = vector.broadcast %50 : vector<8x1xf32> to vector<8x512xf32>
    %52 = arith.addf %49, %51 : vector<8x512xf32>
    %cst_25 = arith.constant 0.000000e+00 : f32
    %53 = vector.broadcast %cst_25 : f32 to vector<8x512xf32>
    %54 = arith.maximumf %52, %53 : vector<8x512xf32>
    %c17_i32_26 = arith.constant 17 : i32
    %55 = tpu.dynamic_rotate %54 by %c17_i32_26 dim 1 : vector<8x512xf32>, i32 -> vector<8x512xf32>
    %c0_27 = arith.constant 0 : index
    %c0_28 = arith.constant 0 : index
    %c0_29 = arith.constant 0 : index
    %56 = vector.load %arg7[%c0_27, %c0_28, %c0_29] : memref<9x1x512xf32, #tpu.memory_space<vmem>>, vector<1x1x512xf32>
    %57 = vector.shape_cast %56 : vector<1x1x512xf32> to vector<1x512xf32>
    %58 = vector.broadcast %57 : vector<1x512xf32> to vector<8x512xf32>
    %59 = arith.mulf %55, %58 : vector<8x512xf32>
    %c16_i32_30 = arith.constant 16 : i32
    %60 = tpu.dynamic_rotate %54 by %c16_i32_30 dim 1 : vector<8x512xf32>, i32 -> vector<8x512xf32>
    %c1_31 = arith.constant 1 : index
    %c0_32 = arith.constant 0 : index
    %c0_33 = arith.constant 0 : index
    %61 = vector.load %arg7[%c1_31, %c0_32, %c0_33] : memref<9x1x512xf32, #tpu.memory_space<vmem>>, vector<1x1x512xf32>
    %62 = vector.shape_cast %61 : vector<1x1x512xf32> to vector<1x512xf32>
    %63 = vector.broadcast %62 : vector<1x512xf32> to vector<8x512xf32>
    %64 = arith.mulf %60, %63 : vector<8x512xf32>
    %c15_i32_34 = arith.constant 15 : i32
    %65 = tpu.dynamic_rotate %54 by %c15_i32_34 dim 1 : vector<8x512xf32>, i32 -> vector<8x512xf32>
    %c2_35 = arith.constant 2 : index
    %c0_36 = arith.constant 0 : index
    %c0_37 = arith.constant 0 : index
    %66 = vector.load %arg7[%c2_35, %c0_36, %c0_37] : memref<9x1x512xf32, #tpu.memory_space<vmem>>, vector<1x1x512xf32>
    %67 = vector.shape_cast %66 : vector<1x1x512xf32> to vector<1x512xf32>
    %68 = vector.broadcast %67 : vector<1x512xf32> to vector<8x512xf32>
    %69 = arith.mulf %65, %68 : vector<8x512xf32>
    %c1_i32_38 = arith.constant 1 : i32
    %70 = tpu.dynamic_rotate %54 by %c1_i32_38 dim 1 : vector<8x512xf32>, i32 -> vector<8x512xf32>
    %c3_39 = arith.constant 3 : index
    %c0_40 = arith.constant 0 : index
    %c0_41 = arith.constant 0 : index
    %71 = vector.load %arg7[%c3_39, %c0_40, %c0_41] : memref<9x1x512xf32, #tpu.memory_space<vmem>>, vector<1x1x512xf32>
    %72 = vector.shape_cast %71 : vector<1x1x512xf32> to vector<1x512xf32>
    %73 = vector.broadcast %72 : vector<1x512xf32> to vector<8x512xf32>
    %74 = arith.mulf %70, %73 : vector<8x512xf32>
    %c4_42 = arith.constant 4 : index
    %c0_43 = arith.constant 0 : index
    %c0_44 = arith.constant 0 : index
    %75 = vector.load %arg7[%c4_42, %c0_43, %c0_44] : memref<9x1x512xf32, #tpu.memory_space<vmem>>, vector<1x1x512xf32>
    %76 = vector.shape_cast %75 : vector<1x1x512xf32> to vector<1x512xf32>
    %77 = vector.broadcast %76 : vector<1x512xf32> to vector<8x512xf32>
    %78 = arith.mulf %54, %77 : vector<8x512xf32>
    %c511_i32_45 = arith.constant 511 : i32
    %79 = tpu.dynamic_rotate %54 by %c511_i32_45 dim 1 : vector<8x512xf32>, i32 -> vector<8x512xf32>
    %c5_46 = arith.constant 5 : index
    %c0_47 = arith.constant 0 : index
    %c0_48 = arith.constant 0 : index
    %80 = vector.load %arg7[%c5_46, %c0_47, %c0_48] : memref<9x1x512xf32, #tpu.memory_space<vmem>>, vector<1x1x512xf32>
    %81 = vector.shape_cast %80 : vector<1x1x512xf32> to vector<1x512xf32>
    %82 = vector.broadcast %81 : vector<1x512xf32> to vector<8x512xf32>
    %83 = arith.mulf %79, %82 : vector<8x512xf32>
    %c497_i32_49 = arith.constant 497 : i32
    %84 = tpu.dynamic_rotate %54 by %c497_i32_49 dim 1 : vector<8x512xf32>, i32 -> vector<8x512xf32>
    %c6_50 = arith.constant 6 : index
    %c0_51 = arith.constant 0 : index
    %c0_52 = arith.constant 0 : index
    %85 = vector.load %arg7[%c6_50, %c0_51, %c0_52] : memref<9x1x512xf32, #tpu.memory_space<vmem>>, vector<1x1x512xf32>
    %86 = vector.shape_cast %85 : vector<1x1x512xf32> to vector<1x512xf32>
    %87 = vector.broadcast %86 : vector<1x512xf32> to vector<8x512xf32>
    %88 = arith.mulf %84, %87 : vector<8x512xf32>
    %c496_i32_53 = arith.constant 496 : i32
    %89 = tpu.dynamic_rotate %54 by %c496_i32_53 dim 1 : vector<8x512xf32>, i32 -> vector<8x512xf32>
    %c7_54 = arith.constant 7 : index
    %c0_55 = arith.constant 0 : index
    %c0_56 = arith.constant 0 : index
    %90 = vector.load %arg7[%c7_54, %c0_55, %c0_56] : memref<9x1x512xf32, #tpu.memory_space<vmem>>, vector<1x1x512xf32>
    %91 = vector.shape_cast %90 : vector<1x1x512xf32> to vector<1x512xf32>
    %92 = vector.broadcast %91 : vector<1x512xf32> to vector<8x512xf32>
    %93 = arith.mulf %89, %92 : vector<8x512xf32>
    %c495_i32_57 = arith.constant 495 : i32
    %94 = tpu.dynamic_rotate %54 by %c495_i32_57 dim 1 : vector<8x512xf32>, i32 -> vector<8x512xf32>
    %c8_58 = arith.constant 8 : index
    %c0_59 = arith.constant 0 : index
    %c0_60 = arith.constant 0 : index
    %95 = vector.load %arg7[%c8_58, %c0_59, %c0_60] : memref<9x1x512xf32, #tpu.memory_space<vmem>>, vector<1x1x512xf32>
    %96 = vector.shape_cast %95 : vector<1x1x512xf32> to vector<1x512xf32>
    %97 = vector.broadcast %96 : vector<1x512xf32> to vector<8x512xf32>
    %98 = arith.mulf %94, %97 : vector<8x512xf32>
    %99 = tpu.concatenate %59, %64, %69, %74, %78, %83, %88, %93, %98 in 0 : vector<8x512xf32>, vector<8x512xf32>, vector<8x512xf32>, vector<8x512xf32>, vector<8x512xf32>, vector<8x512xf32>, vector<8x512xf32>, vector<8x512xf32>, vector<8x512xf32> -> vector<72x512xf32>
    %100 = arith.truncf %99 : vector<72x512xf32> to vector<72x512xbf16>
    %c0_61 = arith.constant 0 : index
    %c0_62 = arith.constant 0 : index
    %101 = vector.load %arg5[%c0_61, %c0_62] : memref<16x72xbf16, #tpu.memory_space<vmem>>, vector<16x72xbf16>
    %cst_63 = arith.constant dense<0.000000e+00> : vector<16x512xf32>
    %102 = tpu.matmul %101, %100, %cst_63 {dimension_numbers = #tpu.dot_dimension_numbers<[1], [0], [0], [1], [0, 0, 1, 1], [], []>} : vector<16x72xbf16>, vector<72x512xbf16>, vector<16x512xf32> -> vector<16x512xf32>
    %103 = arith.truncf %102 : vector<16x512xf32> to vector<16x512xbf16>
    %c0_64 = arith.constant 0 : index
    %c0_65 = arith.constant 0 : index
    %104 = vector.load %arg8[%c0_64, %c0_65] : memref<512x128xbf16, #tpu.memory_space<vmem>>, vector<512x128xbf16>
    %cst_66 = arith.constant dense<0.000000e+00> : vector<16x128xf32>
    %105 = tpu.matmul %103, %104, %cst_66 {dimension_numbers = #tpu.dot_dimension_numbers<[1], [0], [0], [1], [0, 0, 1, 1], [], []>} : vector<16x512xbf16>, vector<512x128xbf16>, vector<16x128xf32> -> vector<16x128xf32>
    %c0_67 = arith.constant 0 : index
    %c0_68 = arith.constant 0 : index
    %106 = vector.load %arg6[%c0_67, %c0_68] : memref<16x1xf32, #tpu.memory_space<vmem>>, vector<16x1xf32>
    %107 = vector.broadcast %106 : vector<16x1xf32> to vector<16x128xf32>
    %108 = arith.addf %105, %107 : vector<16x128xf32>
    %cst_69 = arith.constant 0.000000e+00 : f32
    %109 = vector.broadcast %cst_69 : f32 to vector<16x128xf32>
    %110 = arith.maximumf %108, %109 : vector<16x128xf32>
    %c0_70 = arith.constant 0 : index
    %c0_71 = arith.constant 0 : index
    %c0_72 = arith.constant 0 : index
    %111 = vector.load %arg9[%c0_70, %c0_71, %c0_72] : memref<1x16x128xf32, #tpu.memory_space<vmem>>, vector<1x16x128xf32>
    %112 = vector.shape_cast %111 : vector<1x16x128xf32> to vector<16x128xf32>
    %113 = vector.shape_cast %110 : vector<16x128xf32> to vector<1x16x128xf32>
    tpu.vector_store %arg9[%c0_70, %c0_71, %c0_72], %113 {strides = array<i32>} : memref<1x16x128xf32, #tpu.memory_space<vmem>>, vector<1x16x128xf32>,
    return
  }
  func.func @transform_0(%arg0: i32) -> (i32, i32, i32) {
    %c0_i32 = arith.constant 0 : i32
    %c0_i32_0 = arith.constant 0 : i32
    %c0_i32_1 = arith.constant 0 : i32
    return %arg0, %c0_i32, %c0_i32_0 : i32, i32, i32
  }
  func.func @transform_1(%arg0: i32) -> (i32, i32) {
    %c0_i32 = arith.constant 0 : i32
    %c0_i32_0 = arith.constant 0 : i32
    %c0_i32_1 = arith.constant 0 : i32
    return %c0_i32, %c0_i32_0 : i32, i32
  }
  func.func @transform_2(%arg0: i32) -> (i32, i32) {
    %c0_i32 = arith.constant 0 : i32
    %c0_i32_0 = arith.constant 0 : i32
    %c0_i32_1 = arith.constant 0 : i32
    return %c0_i32, %c0_i32_0 : i32, i32
  }
  func.func @transform_3(%arg0: i32) -> (i32, i32, i32) {
    %c0_i32 = arith.constant 0 : i32
    %c0_i32_0 = arith.constant 0 : i32
    %c0_i32_1 = arith.constant 0 : i32
    %c0_i32_2 = arith.constant 0 : i32
    return %c0_i32, %c0_i32_0, %c0_i32_1 : i32, i32, i32
  }
  func.func @transform_4(%arg0: i32) -> (i32, i32) {
    %c0_i32 = arith.constant 0 : i32
    %c0_i32_0 = arith.constant 0 : i32
    %c0_i32_1 = arith.constant 0 : i32
    return %c0_i32, %c0_i32_0 : i32, i32
  }
  func.func @transform_5(%arg0: i32) -> (i32, i32) {
    %c0_i32 = arith.constant 0 : i32
    %c0_i32_0 = arith.constant 0 : i32
    %c0_i32_1 = arith.constant 0 : i32
    return %c0_i32, %c0_i32_0 : i32, i32
  }
  func.func @transform_6(%arg0: i32) -> (i32, i32, i32) {
    %c0_i32 = arith.constant 0 : i32
    %c0_i32_0 = arith.constant 0 : i32
    %c0_i32_1 = arith.constant 0 : i32
    %c0_i32_2 = arith.constant 0 : i32
    return %c0_i32, %c0_i32_0, %c0_i32_1 : i32, i32, i32
  }
  func.func @transform_7(%arg0: i32) -> (i32, i32) {
    %c0_i32 = arith.constant 0 : i32
    %c0_i32_0 = arith.constant 0 : i32
    %c0_i32_1 = arith.constant 0 : i32
    return %c0_i32, %c0_i32_0 : i32, i32
  }
  func.func @transform_8(%arg0: i32) -> (i32, i32, i32) {
    %c0_i32 = arith.constant 0 : i32
    %c0_i32_0 = arith.constant 0 : i32
    %c0_i32_1 = arith.constant 0 : i32
    return %arg0, %c0_i32, %c0_i32_0 : i32, i32, i32
  }
}

</mosaic_0001>

<bundles_post_ra>
// kernel: simple_cnn_forward.1
= control target key start
LH: loop header
LB: loop body
LE: loop exit
PB: predicated region body
PF: predicated region fallthrough
CT: control target
= control target key end

     0   :  { %s1485_s29 = smov 16   ;;  %s1486_s30 = smov 17   ;;  %v1492_v4 = vmov 0   ;;  %v42_v6 = vlaneseq  ;;  %vm413_vm8 = vcmask 1043456   ;;  %vm409_vm9 = vcmask 588800   ;;  %s2199_s0 = inlined_call_operand.vmem [shape: f32[1,8,512], index: 0, kind: input, shape index: {}]   ;;  %s2200_s2 = inlined_call_operand.vmem [shape: f32[8,1], index: 2, kind: input, shape index: {}]   ;;  %s2201_s3 = inlined_call_operand.vmem [shape: f32[9,1,512], index: 3, kind: input, shape index: {}, may-alias: {3,6}]   ;;  %s2202_s1 = inlined_call_operand.vmem [shape: bf16[8,72], index: 1, kind: input, shape index: {}]   ;;  %s2203_s5 = inlined_call_operand.vmem [shape: f32[16,1], index: 5, kind: input, shape index: {}]   ;;  %s2204_s4 = inlined_call_operand.vmem [shape: bf16[16,72], index: 4, kind: input, shape index: {}]   ;;  %s2205_s7 = inlined_call_operand.vmem [shape: bf16[512,128], index: 7, kind: input, shape index: {}]   ;;  %s2206_s6 = inlined_call_operand.vmem [shape: f32[9,1,512], index: 6, kind: input, shape index: {}, may-alias: {3,6}]   ;;  %s2207_s8 = inlined_call_operand.vmem [shape: f32[1,16,128], index: 8, kind: output, shape index: {}]  }
   0x1   :  { %v1542_v0 = vld [vmem:[%s2199_s0] sm:$0xff]  ;;  %v1551_v1 = vld [vmem:[%s2199_s0 + $0x8] sm:$0xff]  ;;  %v1560_v2 = vld [vmem:[%s2199_s0 + $0x18] sm:$0xff]  ;;  %s1487_s15 = smov 15   ;;  %s1489_s16 = smov 127   ;;  %458 = vmatprep.mubr.bf16.mxu0 %v1492_v4  ;;  %499 = vmatprep.mubr.bf16.mxu1 %v1492_v4 }
   0x2   :  { %75 = vrot.lane.b32.xlu1 %v1542_v0, %s1485_s29  ;;  %34 = vrot.lane.b32.xlu0 %v1542_v0, %s1486_s30  ;;  %v1565_v3 = vld [vmem:[%s2199_s0 + $0x10] sm:$0xff]  ;;  %s1488_s0 = smov 1   ;;  %s1490_s17 = smov 113   ;;  %v403_v5 = vld [vmem:[%s2200_s2] sm:$0xff]  ;;  %v52_v7 = vshrl.u32 %v42_v6, 7  ;;  %v1630_v8 = vand.u32 127, %v42_v6 }
   0x3   :  { %s1491_s18 = smov 112   ;;  %1450 = vset.pattern.permute.xlu0 %v1492_v4  ;;  %1451 = vset.pattern.permute.xlu1 %v1492_v4  ;;  %s1493_s19 = smov 111   ;;  %v49_v10 = vld [vmem:[%s2201_s3] sm:$0xf]  ;;  %v1340_v11 = vld [vmem:[%s2201_s3 + $0x4] sm:$0xf] }
   0x4   :  { %v1632_v9 = vsub.s32 1, %v52_v7  ;;  %vm83_vm0 = vcmp.lt.s32.totalorder %v1630_v8, 16  ;;  %vm44_vm1 = vcmp.lt.s32.totalorder %v1630_v8, 17  ;;  %v1644_v16 = vsub.s32 0, %v52_v7  ;;  %v1341_v48 = vld [vmem:[%s2201_s3 + $0x8] sm:$0xf] }
   0x5   :  { %v1646_v19 = vsub.s32 2, %v52_v7  ;;  %v1652_v22 = vsub.s32 3, %v52_v7  ;;  %v1342_v49 = vld [vmem:[%s2201_s3 + $0xc] sm:$0xf]  ;;  %vm123_vm2 = vcmp.lt.s32.totalorder %v1630_v8, 15  ;;  %vm163_vm3 = vcmp.lt.s32.totalorder %v1630_v8, 1 }
   0x6   :  { %77 = vrot.lane.b32.xlu1 %v1551_v1, %s1485_s29  ;;  %36 = vrot.lane.b32.xlu0 %v1551_v1, %s1486_s30  ;;  %v58_v14 = vrot.slane %v49_v10, %v1632_v9  ;;  %v98_v15 = vrot.slane %v1340_v11, %v1632_v9  ;;  %v54_v25 = vrot.slane %v49_v10, %v1644_v16  ;;  %vm230_vm4 = vcmp.lt.s32.totalorder %v1630_v8, 127 }
   0x7   :  { %v62_v30 = vrot.slane %v49_v10, %v1646_v19  ;;  %v94_v31 = vrot.slane %v1340_v11, %v1644_v16  ;;  %v102_v33 = vrot.slane %v1340_v11, %v1646_v19  ;;  %v66_v34 = vrot.slane %v49_v10, %v1652_v22  ;;  %v1343_v10 = vld [vmem:[%s2201_s3 + $0x10] sm:$0xf] }
   0x8   :  { %v106_v35 = vrot.slane %v1340_v11, %v1652_v22  ;;  %v138_v55 = vrot.slane %v1341_v48, %v1632_v9  ;;  %v178_v56 = vrot.slane %v1342_v49, %v1632_v9  ;;  %v134_v63 = vrot.slane %v1341_v48, %v1644_v16 }
   0x9   :  { %vm270_vm5 = vcmp.lt.s32.totalorder %v1630_v8, 113  ;;  %vm310_vm6 = vcmp.lt.s32.totalorder %v1630_v8, 112  ;;  %vm350_vm7 = vcmp.lt.s32.totalorder %v1630_v8, 111  ;;  %v1455_v8 = vld [vmem:[%s2205_s7 + $0x48] sm:$0xff]  }
   0xa   :  { %40 = vrot.lane.b32.xlu1 %v1560_v2, %s1486_s30  ;;  %38 = vrot.lane.b32.xlu0 %v1565_v3, %s1486_s30 }
   0xe   :  { %81 = vrot.lane.b32.xlu1 %v1560_v2, %s1485_s29  ;;  %79 = vrot.lane.b32.xlu0 %v1565_v3, %s1485_s29 }
  0x12   :  { %117 = vrot.lane.b32.xlu1 %v1551_v1, %s1487_s15  ;;  %115 = vrot.lane.b32.xlu0 %v1542_v0, %s1487_s15 }
  0x16   :  { %157 = vrot.lane.b32.xlu1 %v1551_v1, %s1488_s0  ;;  %155 = vrot.lane.b32.xlu0 %v1542_v0, %s1488_s0 }
  0x1a   :  { %121 = vrot.lane.b32.xlu1 %v1560_v2, %s1487_s15  ;;  %119 = vrot.lane.b32.xlu0 %v1565_v3, %s1487_s15 }
  0x1e   :  { %161 = vrot.lane.b32.xlu1 %v1560_v2, %s1488_s0  ;;  %159 = vrot.lane.b32.xlu0 %v1565_v3, %s1488_s0 }
  0x22   :  { %226 = vrot.lane.b32.xlu1 %v1565_v3, %s1489_s16  ;;  %224 = vrot.lane.b32.xlu0 %v1551_v1, %s1489_s16 }
  0x26   :  { %228 = vrot.lane.b32.xlu1 %v1560_v2, %s1489_s16  ;;  %222 = vrot.lane.b32.xlu0 %v1542_v0, %s1489_s16 }
  0x2a   :  { %266 = vrot.lane.b32.xlu1 %v1565_v3, %s1490_s17  ;;  %264 = vrot.lane.b32.xlu0 %v1551_v1, %s1490_s17 }
  0x2e   :  { %306 = vrot.lane.b32.xlu1 %v1565_v3, %s1491_s18  ;;  %304 = vrot.lane.b32.xlu0 %v1551_v1, %s1491_s18 }
  0x32   :  { %268 = vrot.lane.b32.xlu1 %v1560_v2, %s1490_s17  ;;  %262 = vrot.lane.b32.xlu0 %v1542_v0, %s1490_s17 }
  0x36   :  { %308 = vrot.lane.b32.xlu1 %v1560_v2, %s1491_s18  ;;  %302 = vrot.lane.b32.xlu0 %v1542_v0, %s1491_s18 }
  0x3a   :  { %344 = vrot.lane.b32.xlu1 %v1551_v1, %s1493_s19  ;;  %342 = vrot.lane.b32.xlu0 %v1542_v0, %s1493_s19 }
  0x3e   :  { %348 = vrot.lane.b32.xlu1 %v1560_v2, %s1493_s19  ;;  %346 = vrot.lane.b32.xlu0 %v1565_v3, %s1493_s19 }
  0x42   :  { %406 = vperm.xlu0 %1450, %v403_v5  }
  0x74   :  { %v76_v12 = vpop.permute.xlu1 %75  ;;  %v35_v13 = vpop.permute.xlu0 %34 }
  0x78   :  { %v78_v17 = vpop.permute.xlu1 %77  ;;  %v37_v18 = vpop.permute.xlu0 %36 }
  0x79   :  { %v86_v20 = vsel %vm83_vm0, %v76_v12, %v78_v17  ;;  %v47_v21 = vsel %vm44_vm1, %v35_v13, %v37_v18 }
  0x7a   :  { %v72_v23 = vmul.f32 %v58_v14, %v47_v21  ;;  %v112_v24 = vmul.f32 %v98_v15, %v86_v20  ;;  %v1344_v14 = vld [vmem:[%s2201_s3 + $0x14] sm:$0xf]  ;;  %v186_v20 = vrot.slane %v1342_v49, %v1652_v22 }
  0x7c   :  { %v41_v26 = vpop.permute.xlu1 %40  ;;  %v39_v27 = vpop.permute.xlu0 %38  ;;  %v383_v28 = vpack.c.bf16 %v112_v24, %v72_v23  ;;  %v205_v23 = vrot.slane %v1343_v10, %v1632_v9 }
  0x7d   :  { %v48_v29 = vsel %vm44_vm1, %v41_v26, %v35_v13  ;;  %v46_v32 = vsel %vm44_vm1, %v37_v18, %v39_v27  ;;  %v45_v36 = vsel %vm44_vm1, %v39_v27, %v41_v26  ;;  %v146_v13 = vrot.slane %v1341_v48, %v1652_v22 }
  0x7e   :  { %426 = vmatprep.subr.bf16.mxu0 %v383_v28  ;;  %v71_v37 = vmul.f32 %v54_v25, %v48_v29  ;;  %v73_v40 = vmul.f32 %v62_v30, %v46_v32  ;;  %v74_v46 = vmul.f32 %v66_v34, %v45_v36  ;;  %v182_v18 = vrot.slane %v1342_v49, %v1646_v19 }
  0x7f   :  { %v245_v27 = vrot.slane %v1344_v14, %v1632_v9  ;;  %v219_v36 = vmul.f32 %v205_v23, %v1551_v1  ;;  %v241_v1 = vrot.slane %v1344_v14, %v1644_v16 }
  0x80   :  { %v82_v38 = vpop.permute.xlu1 %81  ;;  %v80_v39 = vpop.permute.xlu0 %79 }
  0x81   :  { %v87_v41 = vsel %vm83_vm0, %v82_v38, %v76_v12  ;;  %v84_v42 = vsel %vm83_vm0, %v80_v39, %v82_v38  ;;  %v85_v43 = vsel %vm83_vm0, %v78_v17, %v80_v39  ;;  %v142_v12 = vrot.slane %v1341_v48, %v1646_v19 }
  0x82   :  { %v111_v44 = vmul.f32 %v94_v31, %v87_v41  ;;  %v113_v45 = vmul.f32 %v102_v33, %v85_v43  ;;  %v114_v47 = vmul.f32 %v106_v35, %v84_v42  ;;  %v174_v17 = vrot.slane %v1342_v49, %v1644_v16 }
  0x83   :  { %v213_v38 = vrot.slane %v1343_v10, %v1652_v22  ;;  %v253_v48 = vrot.slane %v1344_v14, %v1652_v22 }
  0x84   :  { %v118_v50 = vpop.permute.xlu1 %117  ;;  %v116_v51 = vpop.permute.xlu0 %115  ;;  %v382_v52 = vpack.c.bf16 %v111_v44, %v71_v37  ;;  %v385_v53 = vpack.c.bf16 %v114_v47, %v74_v46  ;;  %v384_v54 = vpack.c.bf16 %v113_v45, %v73_v40  ;;  %v201_v37 = vrot.slane %v1343_v10, %v1644_v16 }
  0x85   :  { %v126_v57 = vsel %vm123_vm2, %v116_v51, %v118_v50  ;;  %v209_v44 = vrot.slane %v1343_v10, %v1646_v19  ;;  %v249_v46 = vrot.slane %v1344_v14, %v1646_v19 }
  0x86   :  { %427 = vmatpush1.bf16.msra.mxu0 %v382_v52  ;;  %467 = vmatprep.subr.bf16.mxu1 %v385_v53  ;;  %v152_v61 = vmul.f32 %v138_v55, %v126_v57  ;;  %v218_v52 = vmul.f32 %v201_v37, %v1542_v0  ;;  %v221_v53 = vmul.f32 %v213_v38, %v1560_v2  ;;  %v1345_v0 = vld [vmem:[%s2201_s3 + $0x18] sm:$0xf]  ;;  %v1346_v2 = vld [vmem:[%s2201_s3 + $0x1c] sm:$0xf] }
  0x87   :  { %468 = vmatpush1.bf16.msra.mxu1 %v384_v54  ;;  %v220_v54 = vmul.f32 %v209_v44, %v1565_v3 }
  0x88   :  { %v158_v58 = vpop.permute.xlu1 %157  ;;  %v156_v59 = vpop.permute.xlu0 %155 }
  0x89   :  { %v166_v60 = vsel %vm163_vm3, %v156_v59, %v158_v58 }
  0x8a   :  { %v192_v62 = vmul.f32 %v178_v56, %v166_v60 }
  0x8c   :  { %v122_v5 = vpop.permute.xlu1 %121  ;;  %v120_v6 = vpop.permute.xlu0 %119  ;;  %v387_v7 = vpack.c.bf16 %v192_v62, %v152_v61 }
  0x8d   :  { %v127_v11 = vsel %vm123_vm2, %v122_v5, %v116_v51  ;;  %v125_v15 = vsel %vm123_vm2, %v118_v50, %v120_v6  ;;  %v124_v21 = vsel %vm123_vm2, %v120_v6, %v122_v5  ;;  %v285_v6 = vrot.slane %v1345_v0, %v1632_v9 }
  0x8e   :  { %428 = vmatprep.subr.bf16.mxu0 %v387_v7  ;;  %v151_v24 = vmul.f32 %v134_v63, %v127_v11  ;;  %v153_v28 = vmul.f32 %v142_v12, %v125_v15  ;;  %v154_v32 = vmul.f32 %v146_v13, %v124_v21  ;;  %v325_v7 = vrot.slane %v1346_v2, %v1632_v9 }
  0x90   :  { %v162_v25 = vpop.permute.xlu1 %161  ;;  %v160_v26 = vpop.permute.xlu0 %159 }
  0x91   :  { %v167_v29 = vsel %vm163_vm3, %v162_v25, %v156_v59  ;;  %v164_v30 = vsel %vm163_vm3, %v160_v26, %v162_v25  ;;  %v165_v31 = vsel %vm163_vm3, %v158_v58, %v160_v26  ;;  %v293_v25 = vrot.slane %v1345_v0, %v1652_v22  ;;  %v1347_v26 = vld [vmem:[%s2201_s3 + $0x20] sm:$0xf] }
  0x92   :  { %v191_v33 = vmul.f32 %v174_v17, %v167_v29  ;;  %v193_v34 = vmul.f32 %v182_v18, %v165_v31  ;;  %v194_v35 = vmul.f32 %v186_v20, %v164_v30  ;;  %v289_v17 = vrot.slane %v1345_v0, %v1646_v19 }
  0x93   :  { %v321_v29 = vrot.slane %v1346_v2, %v1644_v16  ;;  %v333_v30 = vrot.slane %v1346_v2, %v1652_v22 }
  0x94   :  { %v227_v39 = vpop.permute.xlu1 %226  ;;  %v225_v40 = vpop.permute.xlu0 %224  ;;  %v386_v41 = vpack.c.bf16 %v191_v33, %v151_v24  ;;  %v389_v42 = vpack.c.bf16 %v194_v35, %v154_v32  ;;  %v388_v43 = vpack.c.bf16 %v193_v34, %v153_v28  ;;  %v281_v24 = vrot.slane %v1345_v0, %v1644_v16 }
  0x95   :  { %v232_v45 = vsel %vm230_vm4, %v225_v40, %v227_v39  ;;  %v329_v28 = vrot.slane %v1346_v2, %v1646_v19  ;;  %v361_v35 = vrot.slane %v1347_v26, %v1644_v16 }
  0x96   :  { %v259_v47 = vmul.f32 %v245_v27, %v232_v45  ;;  %429 = vmatpush1.bf16.msra.mxu0 %v386_v41  ;;  %469 = vmatprep.subr.bf16.mxu1 %v389_v42 }
  0x97   :  { %470 = vmatpush1.bf16.msra.mxu1 %v388_v43 }
  0x98   :  { %v229_v49 = vpop.permute.xlu1 %228  ;;  %v223_v50 = vpop.permute.xlu0 %222  ;;  %v391_v51 = vpack.c.bf16 %v259_v47, %v219_v36 }
  0x99   :  { %v231_v55 = vsel %vm230_vm4, %v227_v39, %v229_v49  ;;  %v233_v56 = vsel %vm230_vm4, %v223_v50, %v225_v40  ;;  %v234_v57 = vsel %vm230_vm4, %v229_v49, %v223_v50  ;;  %v373_v49 = vrot.slane %v1347_v26, %v1652_v22 }
  0x9a   :  { %v260_v58 = vmul.f32 %v249_v46, %v231_v55  ;;  %v258_v59 = vmul.f32 %v241_v1, %v233_v56  ;;  %v261_v60 = vmul.f32 %v253_v48, %v234_v57  ;;  %430 = vmatprep.subr.bf16.mxu0 %v391_v51  ;;  %v365_v51 = vrot.slane %v1347_v26, %v1632_v9 }
  0x9c   :  { %v267_v3 = vpop.permute.xlu1 %266  ;;  %v265_v61 = vpop.permute.xlu0 %264  ;;  %v390_v62 = vpack.c.bf16 %v258_v59, %v218_v52  ;;  %v393_v63 = vpack.c.bf16 %v261_v60, %v221_v53  ;;  %v392_v5 = vpack.c.bf16 %v260_v58, %v220_v54  ;;  %v369_v52 = vrot.slane %v1347_v26, %v1646_v19 }
  0x9d   :  { %v272_v10 = vsel %vm270_vm5, %v265_v61, %v267_v3 }
  0x9e   :  { %431 = vmatpush1.bf16.msra.mxu0 %v390_v62  ;;  %471 = vmatprep.subr.bf16.mxu1 %v393_v63  ;;  %v299_v14 = vmul.f32 %v285_v6, %v272_v10 }
  0x9f   :  { %472 = vmatpush1.bf16.msra.mxu1 %v392_v5  ;;  %v402_v5 = vld [vmem:[%s2202_s1] sm:$0xf] }
  0xa0   :  { %v307_v11 = vpop.permute.xlu1 %306  ;;  %v305_v12 = vpop.permute.xlu0 %304 }
  0xa1   :  { %v312_v13 = vsel %vm310_vm6, %v305_v12, %v307_v11 }
  0xa2   :  { %v339_v15 = vmul.f32 %v325_v7, %v312_v13 }
  0xa4   :  { %v269_v18 = vpop.permute.xlu1 %268  ;;  %v263_v20 = vpop.permute.xlu0 %262  ;;  %v395_v21 = vpack.c.bf16 %v339_v15, %v299_v14 }
  0xa5   :  { %v271_v23 = vsel %vm270_vm5, %v267_v3, %v269_v18  ;;  %v273_v27 = vsel %vm270_vm5, %v263_v20, %v265_v61  ;;  %v274_v31 = vsel %vm270_vm5, %v269_v18, %v263_v20 }
  0xa6   :  { %432 = vmatprep.subr.bf16.mxu0 %v395_v21  ;;  %v300_v32 = vmul.f32 %v289_v17, %v271_v23  ;;  %v298_v36 = vmul.f32 %v281_v24, %v273_v27  ;;  %v301_v40 = vmul.f32 %v293_v25, %v274_v31  ;;  %v1046_v27 = vld [vmem:[%s2203_s5] sm:$0xff] }
  0xa8   :  { %v309_v33 = vpop.permute.xlu1 %308  ;;  %v303_v34 = vpop.permute.xlu0 %302 }
  0xa9   :  { %v311_v37 = vsel %vm310_vm6, %v307_v11, %v309_v33  ;;  %v313_v38 = vsel %vm310_vm6, %v303_v34, %v305_v12  ;;  %v314_v39 = vsel %vm310_vm6, %v309_v33, %v303_v34 }
  0xaa   :  { %v340_v41 = vmul.f32 %v329_v28, %v311_v37  ;;  %v338_v42 = vmul.f32 %v321_v29, %v313_v38  ;;  %v341_v43 = vmul.f32 %v333_v30, %v314_v39 }
  0xac   :  { %v345_v44 = vpop.permute.xlu1 %344  ;;  %v343_v45 = vpop.permute.xlu0 %342  ;;  %v394_v46 = vpack.c.bf16 %v338_v42, %v298_v36  ;;  %v397_v47 = vpack.c.bf16 %v341_v43, %v301_v40  ;;  %v396_v1 = vpack.c.bf16 %v340_v41, %v300_v32  ;;  %v524_v42 = vld [vmem:[%s2206_s6] sm:$0xf]  ;;  %v1352_v43 = vld [vmem:[%s2206_s6 + $0x4] sm:$0xf] }
  0xad   :  { %v353_v48 = vsel %vm350_vm7, %v343_v45, %v345_v44 }
  0xae   :  { %v378_v50 = vmul.f32 %v361_v35, %v353_v48  ;;  %433 = vmatpush1.bf16.msra.mxu0 %v394_v46  ;;  %473 = vmatprep.subr.bf16.mxu1 %v397_v47  ;;  %v1355_v46 = vld [vmem:[%s2206_s6 + $0x10] sm:$0xf]  ;;  %v533_v47 = vrot.slane %v524_v42, %v1632_v9 }
  0xaf   :  { %474 = vmatpush1.bf16.msra.mxu1 %v396_v1  ;;  %v572_v1 = vrot.slane %v1352_v43, %v1632_v9 }
  0xb0   :  { %v349_v53 = vpop.permute.xlu1 %348  ;;  %v347_v54 = vpop.permute.xlu0 %346  ;;  %v398_v58 = vpack.c.bf16 %v378_v50, %v378_v50 }
  0xb1   :  { %v354_v55 = vsel %vm350_vm7, %v349_v53, %v343_v45  ;;  %v351_v56 = vsel %vm350_vm7, %v347_v54, %v349_v53  ;;  %v352_v57 = vsel %vm350_vm7, %v345_v44, %v347_v54  ;;  %v681_v53 = vrot.slane %v1355_v46, %v1646_v19 }
  0xb2   :  { %v381_v59 = vmul.f32 %v373_v49, %v354_v55  ;;  %v379_v60 = vmul.f32 %v365_v51, %v352_v57  ;;  %v380_v0 = vmul.f32 %v369_v52, %v351_v56  ;;  %v415_v62 = vsel %vm413_vm8, %v398_v58, 0 }
  0xb3   :  { %v529_v49 = vrot.slane %v524_v42, %v1644_v16  ;;  %v673_v52 = vrot.slane %v1355_v46, %v1644_v16  ;;  %v541_v54 = vrot.slane %v524_v42, %v1652_v22  ;;  %v576_v55 = vrot.slane %v1352_v43, %v1646_v19 }
  0xb4   :  { %v401_v2 = vpack.c.bf16 %v381_v59, %v381_v59  ;;  %v399_v3 = vpack.c.bf16 %v379_v60, %v379_v60  ;;  %v400_v61 = vpack.c.bf16 %v380_v0, %v380_v0  ;;  %v568_v57 = vrot.slane %v1352_v43, %v1644_v16 }
  0xb5   :  { %v580_v0 = vrot.slane %v1352_v43, %v1652_v22 }
  0xb6   :  { %1348 = vmatprep.subr.msk.bf16.mxu0 %vm413_vm8, %v399_v3  ;;  %1350 = vmatprep.subr.msk.bf16.mxu1 %vm413_vm8, %v401_v2  ;;  %v421_v63 = vsel %vm413_vm8, %v400_v61, 0  ;;  %v677_v61 = vrot.slane %v1355_v46, %v1632_v9 }
  0xb7   :  { %435 = vmatpush1.bf16.msra.mxu0 %v415_v62  ;;  %476 = vmatpush1.bf16.msra.mxu1 %v421_v63  ;;  %v685_v62 = vrot.slane %v1355_v46, %v1652_v22  ;;  %v537_v63 = vrot.slane %v524_v42, %v1646_v19 }
  0xba   :  { %1349 = vmatmul.mubr.msk.bf16.vlgmr.msra.gmra.mrb[0].mxu0 %vm409_vm9, %v402_v5  ;;  %1351 = vmatmul.mubr.msk.bf16.vlgmr.msra.gmra.mrb[0].mxu1 %vm409_vm9, %v402_v5  ;;  %v1921_v5 = vld [vmem:[%s2206_s6 + $0x8] sm:$0xf] }
  0xbb   :  { %924 = vmatprep.mubr.bf16.mxu0 %v1492_v4  ;;  %967 = vmatprep.mubr.bf16.mxu1 %v1492_v4  ;;  %v619_v43 = vrot.slane %v1921_v5, %v1652_v22 }
  0xc1   :  { %v407_v6 = vpop.permute.xlu0 %406 }
 0x18d   :  { %v501_v7 = vpop.f32.mrb[0].mxu1  ;;  %v460_v10 = vpop.f32.mrb[0].mxu0 }
 0x18e   :  { %v461_v11 = vadd.f32 %v460_v10, %v407_v6  ;;  %v462_v12 = vpop.f32.mrb[1].mxu0  ;;  %v503_v13 = vpop.f32.mrb[1].mxu1  ;;  %v502_v17 = vadd.f32 %v501_v7, %v407_v6 }
 0x18f   :  { %v464_v14 = vpop.f32.mrb[2].mxu0  ;;  %v505_v15 = vpop.f32.mrb[2].mxu1  ;;  %v463_v23 = vadd.f32 %v462_v12, %v407_v6  ;;  %v504_v25 = vadd.f32 %v503_v13, %v407_v6 }
 0x190   :  { %v1790_v18 = vmax.f32 %v461_v11, 0.0  ;;  %v465_v20 = vpop.f32.mrb[3].mxu0  ;;  %v506_v21 = vpop.f32.mrb[3].mxu1  ;;  %v1796_v4 = vmax.f32 %v502_v17, 0.0 }
 0x191   :  { %v1822_v24 = vmax.f32 %v463_v23, 0.0  ;;  %v1828_v26 = vmax.f32 %v504_v25, 0.0  ;;  %v607_v25 = vrot.slane %v1921_v5, %v1644_v16 }
 0x192   :  { %550 = vrot.lane.b32.xlu0 %v1790_v18, %s1485_s29  ;;  %512 = vrot.lane.b32.xlu1 %v1790_v18, %s1486_s30  ;;  %v1924_v11 = vmul.f32 %v673_v52, %v1790_v18 }
 0x196   :  { %516 = vrot.lane.b32.xlu0 %v1796_v4, %s1486_s30  ;;  %554 = vrot.lane.b32.xlu1 %v1796_v4, %s1485_s29 }
 0x19a   :  { %589 = vrot.lane.b32.xlu0 %v1790_v18, %s1487_s15  ;;  %632 = vrot.lane.b32.xlu1 %v1796_v4, %s1488_s0 }
 0x19e   :  { %628 = vrot.lane.b32.xlu0 %v1790_v18, %s1488_s0  ;;  %698 = vrot.lane.b32.xlu1 %v1796_v4, %s1489_s16 }
 0x1a2   :  { %593 = vrot.lane.b32.xlu0 %v1796_v4, %s1487_s15  ;;  %737 = vrot.lane.b32.xlu1 %v1796_v4, %s1490_s17 }
 0x1a6   :  { %694 = vrot.lane.b32.xlu0 %v1790_v18, %s1489_s16  ;;  %776 = vrot.lane.b32.xlu1 %v1796_v4, %s1491_s18 }
 0x1aa   :  { %733 = vrot.lane.b32.xlu0 %v1790_v18, %s1490_s17  ;;  %772 = vrot.lane.b32.xlu1 %v1790_v18, %s1491_s18 }
 0x1ae   :  { %811 = vrot.lane.b32.xlu0 %v1790_v18, %s1493_s19  ;;  %514 = vrot.lane.b32.xlu1 %v1822_v24, %s1486_s30  ;;  %v1935_v18 = vld [vmem:[%s2206_s6 + $0x14] sm:$0xf] }
 0x1b2   :  { %518 = vrot.lane.b32.xlu0 %v1828_v26, %s1486_s30  ;;  %552 = vrot.lane.b32.xlu1 %v1822_v24, %s1485_s29 }
 0x1b6   :  { %595 = vrot.lane.b32.xlu0 %v1828_v26, %s1487_s15  ;;  %556 = vrot.lane.b32.xlu1 %v1828_v26, %s1485_s29 }
 0x1ba   :  { %696 = vrot.lane.b32.xlu0 %v1822_v24, %s1489_s16  ;;  %591 = vrot.lane.b32.xlu1 %v1822_v24, %s1487_s15 }
 0x1be   :  { %735 = vrot.lane.b32.xlu0 %v1822_v24, %s1490_s17  ;;  %630 = vrot.lane.b32.xlu1 %v1822_v24, %s1488_s0 }
 0x1c2   :  { %774 = vrot.lane.b32.xlu0 %v1822_v24, %s1491_s18  ;;  %634 = vrot.lane.b32.xlu1 %v1828_v26, %s1488_s0 }
 0x1c6   :  { %739 = vrot.lane.b32.xlu0 %v1828_v26, %s1490_s17  ;;  %700 = vrot.lane.b32.xlu1 %v1828_v26, %s1489_s16 }
 0x1ca   :  { %815 = vrot.lane.b32.xlu0 %v1796_v4, %s1493_s19  ;;  %778 = vrot.lane.b32.xlu1 %v1828_v26, %s1491_s18 }
 0x1ce   :  { %1050 = vperm.xlu0 %1450, %v1046_v27   ;;  %813 = vrot.lane.b32.xlu1 %v1822_v24, %s1493_s19  ;;  %v1942_v27 = vld [vmem:[%s2206_s6 + $0x18] sm:$0xf] }
 0x1cf   :  { %v755_v52 = vrot.slane %v1942_v27, %v1632_v9 }
 0x1d2   :  { %817 = vrot.lane.b32.xlu1 %v1828_v26, %s1493_s19 }
 0x204   :  { %v551_v28 = vpop.permute.xlu0 %550  ;;  %v513_v29 = vpop.permute.xlu1 %512 }
 0x208   :  { %v517_v30 = vpop.permute.xlu0 %516  ;;  %v555_v31 = vpop.permute.xlu1 %554 }
 0x20c   :  { %v1865_v32 = vpop.permute.xlu0 %589  ;;  %v1867_v33 = vpop.permute.xlu1 %632 }
 0x210   :  { %v1869_v34 = vpop.permute.xlu0 %628  ;;  %v1871_v35 = vpop.permute.xlu1 %698 }
 0x214   :  { %v1873_v36 = vpop.permute.xlu0 %593  ;;  %v1875_v37 = vpop.permute.xlu1 %737 }
 0x218   :  { %v1877_v38 = vpop.permute.xlu0 %694  ;;  %v1879_v39 = vpop.permute.xlu1 %776 }
 0x21c   :  { %v1881_v40 = vpop.permute.xlu0 %733  ;;  %v1883_v41 = vpop.permute.xlu1 %772 }
 0x220   :  { %v1891_v44 = vpop.permute.xlu0 %811  ;;  %v515_v45 = vpop.permute.xlu1 %514 }
 0x221   :  { %v522_v48 = vsel %vm44_vm1, %v513_v29, %v515_v45  ;;  %v521_v12 = vsel %vm44_vm1, %v515_v45, %v517_v30 }
 0x222   :  { %v547_v58 = vmul.f32 %v533_v47, %v522_v48  ;;  %v548_v42 = vmul.f32 %v537_v63, %v521_v12  ;;  %v1961_v48 = vld [vmem:[%s2206_s6 + $0x1c] sm:$0xf]  ;;  %v720_v63 = vrot.slane %v1935_v18, %v1646_v19 }
 0x224   :  { %v519_v50 = vpop.permute.xlu0 %518  ;;  %v553_v51 = vpop.permute.xlu1 %552 }
 0x225   :  { %v560_v56 = vsel %vm83_vm0, %v551_v28, %v553_v51  ;;  %v523_v59 = vsel %vm44_vm1, %v519_v50, %v513_v29  ;;  %v520_v2 = vsel %vm44_vm1, %v517_v30, %v519_v50  ;;  %v559_v3 = vsel %vm83_vm0, %v553_v51, %v555_v31 }
 0x226   :  { %v586_v60 = vmul.f32 %v572_v1, %v560_v56  ;;  %v546_v13 = vmul.f32 %v529_v49, %v523_v59  ;;  %v549_v17 = vmul.f32 %v541_v54, %v520_v2  ;;  %v587_v20 = vmul.f32 %v576_v55, %v559_v3 }
 0x227   :  { %v1948_v29 = vmul.f32 %v681_v53, %v1796_v4  ;;  %v1951_v30 = vmul.f32 %v677_v61, %v1822_v24  ;;  %v712_v4 = vrot.slane %v1935_v18, %v1644_v16  ;;  %v716_v24 = vrot.slane %v1935_v18, %v1632_v9 }
 0x228   :  { %v596_v6 = vpop.permute.xlu0 %595  ;;  %v557_v7 = vpop.permute.xlu1 %556  ;;  %v851_v10 = vpack.c.bf16 %v586_v60, %v547_v58  ;;  %v615_v49 = vrot.slane %v1921_v5, %v1646_v19  ;;  %v852_v50 = vpack.c.bf16 %v587_v20, %v548_v42  ;;  %v751_v51 = vrot.slane %v1942_v27, %v1644_v16 }
 0x229   :  { %v558_v14 = vsel %vm83_vm0, %v555_v31, %v557_v7  ;;  %v561_v15 = vsel %vm83_vm0, %v557_v7, %v551_v28  ;;  %v1354_v28 = vld [vmem:[%s2206_s6 + $0xc] sm:$0xf]  ;;  %v1954_v31 = vmul.f32 %v685_v62, %v1828_v26  ;;  %v611_v26 = vrot.slane %v1921_v5, %v1632_v9  ;;  %v2003_v7 = vld [vmem:[%s2206_s6 + $0x20] sm:$0xf] }
 0x22a   :  { %v585_v21 = vmul.f32 %v568_v57, %v561_v15  ;;  %v588_v23 = vmul.f32 %v580_v0, %v558_v14  ;;  %892 = vmatprep.subr.bf16.mxu0 %v851_v10  ;;  %v650_v53 = vrot.slane %v1354_v28, %v1632_v9  ;;  %v654_v55 = vrot.slane %v1354_v28, %v1646_v19 }
 0x22b   :  { %v790_v56 = vrot.slane %v1961_v48, %v1644_v16  ;;  %v794_v57 = vrot.slane %v1961_v48, %v1632_v9  ;;  %v646_v0 = vrot.slane %v1354_v28, %v1644_v16  ;;  %v658_v2 = vrot.slane %v1354_v28, %v1652_v22 }
 0x22c   :  { %v850_v45 = vpack.c.bf16 %v585_v21, %v546_v13  ;;  %v697_v46 = vpop.permute.xlu0 %696  ;;  %v592_v47 = vpop.permute.xlu1 %591  ;;  %v853_v1 = vpack.c.bf16 %v588_v23, %v549_v17  ;;  %v759_v3 = vrot.slane %v1942_v27, %v1646_v19  ;;  %v763_v62 = vrot.slane %v1942_v27, %v1652_v22 }
 0x22d   :  { %v599_v54 = vsel %vm123_vm2, %v1865_v32, %v592_v47  ;;  %v703_v58 = vsel %vm230_vm4, %v697_v46, %v1871_v35  ;;  %v724_v5 = vrot.slane %v1935_v18, %v1652_v22  ;;  %v597_v10 = vsel %vm123_vm2, %v1873_v36, %v596_v6 }
 0x22e   :  { %893 = vmatpush1.bf16.msra.mxu0 %v850_v45  ;;  %935 = vmatprep.subr.bf16.mxu1 %v853_v1  ;;  %v600_v12 = vsel %vm123_vm2, %v596_v6, %v1865_v32  ;;  %v625_v13 = vmul.f32 %v611_v26, %v599_v54  ;;  %v730_v15 = vmul.f32 %v716_v24, %v703_v58 }
 0x22f   :  { %936 = vmatpush1.bf16.msra.mxu1 %v852_v50  ;;  %v798_v20 = vrot.slane %v1961_v48, %v1646_v19  ;;  %v802_v21 = vrot.slane %v1961_v48, %v1652_v22  ;;  %v704_v23 = vsel %vm230_vm4, %v1877_v38, %v697_v46  ;;  %v598_v32 = vsel %vm123_vm2, %v592_v47, %v1873_v36 }
 0x230   :  { %v736_v59 = vpop.permute.xlu0 %735  ;;  %v631_v60 = vpop.permute.xlu1 %630  ;;  %v829_v42 = vrot.slane %v2003_v7, %v1644_v16  ;;  %v624_v45 = vmul.f32 %v607_v25, %v600_v12  ;;  %v627_v1 = vmul.f32 %v619_v43, %v597_v10  ;;  %v729_v50 = vmul.f32 %v712_v4, %v704_v23 }
 0x231   :  { %v638_v61 = vsel %vm163_vm3, %v1869_v34, %v631_v60  ;;  %v637_v17 = vsel %vm163_vm3, %v631_v60, %v1867_v33  ;;  %v859_v25 = vpack.c.bf16 %v730_v15, %v1951_v30  ;;  %v833_v43 = vrot.slane %v2003_v7, %v1632_v9 }
 0x232   :  { %v664_v14 = vmul.f32 %v650_v53, %v638_v61  ;;  %v665_v24 = vmul.f32 %v654_v55, %v637_v17  ;;  %v626_v53 = vmul.f32 %v615_v49, %v598_v32  ;;  %v858_v10 = vpack.c.bf16 %v729_v50, %v1924_v11  ;;  %v1461_v50 = vld [vmem:[%s2205_s7 + $0x10] sm:$0xff]  }
 0x234   :  { %v775_v6 = vpop.permute.xlu0 %774  ;;  %v635_v18 = vpop.permute.xlu1 %634  ;;  %v855_v28 = vpack.c.bf16 %v664_v14, %v625_v13 }
 0x235   :  { %v636_v48 = vsel %vm163_vm3, %v1867_v33, %v635_v18  ;;  %v639_v46 = vsel %vm163_vm3, %v635_v18, %v1869_v34  ;;  %v781_v36 = vsel %vm310_vm6, %v775_v6, %v1879_v39  ;;  %v742_v33 = vsel %vm270_vm5, %v736_v59, %v1875_v37 }
 0x236   :  { %v663_v47 = vmul.f32 %v646_v0, %v639_v46  ;;  %v666_v26 = vmul.f32 %v658_v2, %v636_v48  ;;  %894 = vmatprep.subr.bf16.mxu0 %v855_v28  ;;  %v743_v34 = vsel %vm270_vm5, %v1881_v40, %v736_v59  ;;  %v782_v4 = vsel %vm310_vm6, %v1883_v41, %v775_v6  ;;  %v1453_v6 = vld [vmem:[%s2205_s7 + $0x40] sm:$0xff]  }
 0x237   :  { %v808_v30 = vmul.f32 %v794_v57, %v781_v36  ;;  %v856_v0 = vpack.c.bf16 %v665_v24, %v626_v53  ;;  %v769_v12 = vmul.f32 %v755_v52, %v742_v33  ;;  %v1457_v24 = vld [vmem:[%s2205_s7 + $0x8] sm:$0xff]   ;;  %v1458_v36 = vld [vmem:[%s2205_s7 + $0x80] sm:$0xff]   ;;  %v1465_v33 = vld [vmem:[%s2205_s7 + $0x18] sm:$0xff]  }
 0x238   :  { %v854_v54 = vpack.c.bf16 %v663_v47, %v624_v45  ;;  %v740_v55 = vpop.permute.xlu0 %739  ;;  %v701_v58 = vpop.permute.xlu1 %700  ;;  %v857_v60 = vpack.c.bf16 %v666_v26, %v627_v1  ;;  %v1454_v45 = vld [vmem:[%s2205_s7] sm:$0xff]   ;;  %v1459_v47 = vld [vmem:[%s2205_s7 + $0x50] sm:$0xff]   ;;  %v1460_v26 = vld [vmem:[%s2205_s7 + $0xc8] sm:$0xff]  }
 0x239   :  { %v702_v9 = vsel %vm230_vm4, %v1871_v35, %v701_v58  ;;  %v705_v49 = vsel %vm230_vm4, %v701_v58, %v1877_v38  ;;  %v741_v59 = vsel %vm270_vm5, %v1875_v37, %v740_v55  ;;  %v744_v57 = vsel %vm270_vm5, %v740_v55, %v1881_v40  ;;  %v1462_v53 = vld [vmem:[%s2205_s7 + $0x88] sm:$0xff]   ;;  %v1468_v55 = vld [vmem:[%s2205_s7 + $0xd8] sm:$0xff]   ;;  %v1469_v58 = vld [vmem:[%s2205_s7 + $0x20] sm:$0xff]  }
 0x23a   :  { %v731_v2 = vmul.f32 %v720_v63, %v702_v9  ;;  %v732_v61 = vmul.f32 %v724_v5, %v705_v49  ;;  %895 = vmatpush1.bf16.msra.mxu0 %v854_v54  ;;  %937 = vmatprep.subr.bf16.mxu1 %v857_v60  ;;  %v768_v35 = vmul.f32 %v751_v51, %v743_v34  ;;  %v1466_v34 = vld [vmem:[%s2205_s7 + $0x90] sm:$0xff]   ;;  %v1467_v54 = vld [vmem:[%s2205_s7 + $0x60] sm:$0xff]   ;;  %v1470_v60 = vld [vmem:[%s2205_s7 + $0x98] sm:$0xff]  }
 0x23b   :  { %896 = vmatprep.subr.bf16.mxu0 %v859_v25  ;;  %v807_v38 = vmul.f32 %v790_v56, %v782_v4  ;;  %938 = vmatpush1.bf16.msra.mxu1 %v856_v0  ;;  %v770_v5 = vmul.f32 %v759_v3, %v741_v59  ;;  %v863_v52 = vpack.c.bf16 %v808_v30, %v769_v12  ;;  %v1463_v25 = vld [vmem:[%s2205_s7 + $0x58] sm:$0xff]   ;;  %v1471_v4 = vld [vmem:[%s2205_s7 + $0x68] sm:$0xff]   ;;  %v1472_v30 = vld [vmem:[%s2205_s7 + $0xe0] sm:$0xff]  }
 0x23c   :  { %v860_v13 = vpack.c.bf16 %v731_v2, %v1948_v29  ;;  %v779_v37 = vpop.permute.xlu1 %778  ;;  %v861_v63 = vpack.c.bf16 %v732_v61, %v1954_v31  ;;  %v771_v14 = vmul.f32 %v763_v62, %v744_v57  ;;  %v816_v51 = vpop.permute.xlu0 %815  ;;  %v837_v62 = vrot.slane %v2003_v7, %v1646_v19  ;;  %v1473_v9 = vld [vmem:[%s2205_s7 + $0x28] sm:$0xff]   ;;  %v1474_v49 = vld [vmem:[%s2205_s7 + $0xa0] sm:$0xff]   ;;  %v1475_v0 = vld [vmem:[%s2205_s7 + $0x70] sm:$0xff]  }
 0x23d   :  { %v780_v11 = vsel %vm310_vm6, %v1879_v39, %v779_v37  ;;  %v783_v40 = vsel %vm310_vm6, %v779_v37, %v1883_v41  ;;  %v862_v29 = vpack.c.bf16 %v807_v38, %v768_v35  ;;  %v1476_v59 = vld [vmem:[%s2205_s7 + $0xe8] sm:$0xff]   ;;  %v1477_v2 = vld [vmem:[%s2205_s7 + $0x30] sm:$0xff]   ;;  %v1481_v57 = vld [vmem:[%s2205_s7 + $0x38] sm:$0xff]  }
 0x23e   :  { %v809_v16 = vmul.f32 %v798_v20, %v780_v11  ;;  %v810_v27 = vmul.f32 %v802_v21, %v783_v40  ;;  %897 = vmatpush1.bf16.msra.mxu0 %v858_v10  ;;  %939 = vmatprep.subr.bf16.mxu1 %v861_v63  ;;  %v841_v20 = vrot.slane %v2003_v7, %v1652_v22  ;;  %v1452_v7 = vld [vmem:[%s2204_s4] sm:$0xff]   ;;  %v1478_v61 = vld [vmem:[%s2205_s7 + $0xa8] sm:$0xff]   ;;  %v1479_v10 = vld [vmem:[%s2205_s7 + $0x78] sm:$0xff]  }
 0x23f   :  { %898 = vmatprep.subr.bf16.mxu0 %v863_v52  ;;  %940 = vmatpush1.bf16.msra.mxu1 %v860_v13  ;;  %v1480_v12 = vld [vmem:[%s2205_s7 + $0xf0] sm:$0xff]   ;;  %v1483_v38 = vld [vmem:[%s2205_s7 + $0xf8] sm:$0xff]   ;;  %v1047_v37 = vld [vmem:[%s2203_s5 + $0x8] sm:$0xff] }
 0x240   :  { %v864_v56 = vpack.c.bf16 %v809_v16, %v770_v5  ;;  %v814_v31 = vpop.permute.xlu1 %813  ;;  %v865_v3 = vpack.c.bf16 %v810_v27, %v771_v14  ;;  %v1482_v35 = vld [vmem:[%s2205_s7 + $0xb0] sm:$0xff]   ;;  %v1484_v13 = vld [vmem:[%s2205_s7 + $0xb8] sm:$0xff]   ;;  %1055 = vperm.xlu1 %1451, %v1047_v37  }
 0x241   :  { %v820_v39 = vsel %vm350_vm7, %v814_v31, %v816_v51  ;;  %v821_v41 = vsel %vm350_vm7, %v1891_v44, %v814_v31 }
 0x242   :  { %v846_v15 = vmul.f32 %v829_v42, %v821_v41  ;;  %v847_v17 = vmul.f32 %v833_v43, %v820_v39  ;;  %899 = vmatpush1.bf16.msra.mxu0 %v862_v29  ;;  %941 = vmatprep.subr.bf16.mxu1 %v865_v3  ;;  %v1464_v43 = vld [vmem:[%s2205_s7 + $0xd0] sm:$0xff]  }
 0x243   :  { %942 = vmatpush1.bf16.msra.mxu1 %v864_v56 }
 0x244   :  { %v866_v21 = vpack.c.bf16 %v846_v15, %v846_v15  ;;  %v867_v23 = vpack.c.bf16 %v847_v17, %v847_v17  ;;  %v818_v32 = vpop.permute.xlu1 %817 }
 0x245   :  { %v819_v18 = vsel %vm350_vm7, %v816_v51, %v818_v32  ;;  %v822_v19 = vsel %vm350_vm7, %v818_v32, %v1891_v44  ;;  %v1456_v44 = vld [vmem:[%s2205_s7 + $0xc0] sm:$0xff]  }
 0x246   :  { %v848_v28 = vmul.f32 %v837_v62, %v819_v18  ;;  %v849_v42 = vmul.f32 %v841_v20, %v822_v19  ;;  %1361 = vmatprep.subr.msk.bf16.mxu0 %vm413_vm8, %v867_v23  ;;  %v881_v22 = vsel %vm413_vm8, %v866_v21, 0 }
 0x247   :  { %901 = vmatpush1.bf16.msra.mxu0 %v881_v22 }
 0x248   :  { %v868_v1 = vpack.c.bf16 %v848_v28, %v848_v28  ;;  %v869_v48 = vpack.c.bf16 %v849_v42, %v849_v42  ;;  %1397 = vmatprep.subr.bf16.mxu0 %v1453_v6 }
 0x24a   :  { %1362 = vmatmul.mubr.msk.bf16.vlgmr.msra.gmra.mrb[4].mxu0 %vm409_vm9, %v1452_v7  ;;  %1363 = vmatprep.subr.msk.bf16.mxu1 %vm413_vm8, %v869_v48  ;;  %v887_v46 = vsel %vm413_vm8, %v868_v1, 0 }
 0x24b   :  { %944 = vmatpush1.bf16.msra.mxu1 %v887_v46  ;;  %1398 = vmatpush3.bf16.msra.mxu0 %v1454_v45 }
 0x24c   :  { %1399 = vmatprep.subr.bf16.mxu0 %v1455_v8  ;;  %1419 = vmatprep.subr.bf16.mxu1 %v1456_v44 }
 0x24d   :  { %v1051_v17 = vpop.permute.xlu0 %1050 }
 0x24e   :  { %1364 = vmatmul.mubr.msk.bf16.vlgmr.msra.gmra.mrb[4].mxu1 %vm409_vm9, %v1452_v7 }
 0x24f   :  { %1400 = vmatpush3.bf16.msra.mxu0 %v1457_v24  ;;  %1420 = vmatpush3.bf16.msra.mxu1 %v1458_v36 }
 0x250   :  { %1401 = vmatprep.subr.bf16.mxu0 %v1459_v47  ;;  %1421 = vmatprep.subr.bf16.mxu1 %v1460_v26 }
 0x253   :  { %1402 = vmatpush3.bf16.msra.mxu0 %v1461_v50  ;;  %1422 = vmatpush3.bf16.msra.mxu1 %v1462_v53 }
 0x254   :  { %1403 = vmatprep.subr.bf16.mxu0 %v1463_v25  ;;  %1423 = vmatprep.subr.bf16.mxu1 %v1464_v43 }
 0x257   :  { %1404 = vmatpush3.bf16.msra.mxu0 %v1465_v33  ;;  %1424 = vmatpush3.bf16.msra.mxu1 %v1466_v34 }
 0x258   :  { %1405 = vmatprep.subr.bf16.mxu0 %v1467_v54  ;;  %1425 = vmatprep.subr.bf16.mxu1 %v1468_v55 }
 0x25b   :  { %1406 = vmatpush3.bf16.msra.mxu0 %v1469_v58  ;;  %1426 = vmatpush3.bf16.msra.mxu1 %v1470_v60 }
 0x25c   :  { %1407 = vmatprep.subr.bf16.mxu0 %v1471_v4  ;;  %1427 = vmatprep.subr.bf16.mxu1 %v1472_v30 }
 0x25f   :  { %1408 = vmatpush3.bf16.msra.mxu0 %v1473_v9  ;;  %1428 = vmatpush3.bf16.msra.mxu1 %v1474_v49 }
 0x260   :  { %1409 = vmatprep.subr.bf16.mxu0 %v1475_v0  ;;  %1429 = vmatprep.subr.bf16.mxu1 %v1476_v59 }
 0x263   :  { %1410 = vmatpush3.bf16.msra.mxu0 %v1477_v2  ;;  %1430 = vmatpush3.bf16.msra.mxu1 %v1478_v61 }
 0x264   :  { %1411 = vmatprep.subr.bf16.mxu0 %v1479_v10  ;;  %1431 = vmatprep.subr.bf16.mxu1 %v1480_v12 }
 0x267   :  { %1412 = vmatpush3.bf16.msra.mxu0 %v1481_v57  ;;  %1432 = vmatpush3.bf16.msra.mxu1 %v1482_v35 }
 0x268   :  { %1433 = vmatprep.subr.bf16.mxu1 %v1483_v38 }
 0x26b   :  { %1434 = vmatpush3.bf16.msra.mxu1 %v1484_v13 }
 0x2bf   :  { %v1056_v32 = vpop.permute.xlu1 %1055 }
 0x31d   :  { %v926_v63 = vpop.f32.mrb[4].mxu0 }
 0x31e   :  { %v928_v5 = vpop.f32.mrb[5].mxu0 }
 0x31f   :  { %v930_v11 = vpop.f32.mrb[6].mxu0 }
 0x320   :  { %v978_v40 = vpack.c.bf16 %v930_v11, %v926_v63  ;;  %v932_v52 = vpop.f32.mrb[7].mxu0 }
 0x321   :  { %v979_v14 = vpack.c.bf16 %v932_v52, %v928_v5  ;;  %v969_v16 = vpop.f32.mrb[4].mxu1 }
 0x322   :  { %v971_v27 = vpop.f32.mrb[5].mxu1 }
 0x323   :  { %v973_v29 = vpop.f32.mrb[6].mxu1  ;;  %1282 = vmatprep.mubr.bf16.mxu0 %v979_v14 }
 0x324   :  { %v980_v51 = vpack.c.bf16 %v973_v29, %v969_v16  ;;  %v975_v56 = vpop.f32.mrb[7].mxu1  ;;  %1283 = vmatmul.mubr.bf16.vlgmr.msra.gmra.mrb[8].mxu0 %v978_v40 }
 0x325   :  { %v981_v31 = vpack.c.bf16 %v975_v56, %v971_v27 }
 0x327   :  { %1323 = vmatprep.mubr.bf16.mxu1 %v981_v31 }
 0x328   :  { %1324 = vmatmul.mubr.bf16.vlgmr.msra.gmra.mrb[8].mxu1 %v980_v51 }
 0x3f7   :  { %v1413_v3 = vpop.f32.mrb[8].mxu0 }
 0x3f8   :  { %v1414_v39 = vpop.f32.mrb[9].mxu0 }
 0x3f9   :  { %v1415_v41 = vadd.f32 %v1414_v39, %v1413_v3  ;;  %v1416_v62 = vpop.f32.mrb[10].mxu0 }
 0x3fa   :  { %v1417_v15 = vpop.f32.mrb[11].mxu0 }
 0x3fb   :  { %v1418_v20 = vadd.f32 %v1417_v15, %v1416_v62  ;;  %v1435_v21 = vpop.f32.mrb[8].mxu1  ;;  %v1285_v6 = vadd.f32 %v1415_v41, %v1051_v17 }
 0x3fc   :  { %v1436_v23 = vpop.f32.mrb[9].mxu1 }
 0x3fd   :  { %v1437_v18 = vadd.f32 %v1436_v23, %v1435_v21  ;;  %v1438_v19 = vpop.f32.mrb[10].mxu1  ;;  %v1288_v22 = vadd.f32 %v1418_v20, %v1056_v32 }
 0x3fe   :  { %v1439_v28 = vpop.f32.mrb[11].mxu1 }
 0x3ff   :  { %v1326_v42 = vadd.f32 %v1437_v18, %v1285_v6  ;;  %v1440_v7 = vadd.f32 %v1439_v28, %v1438_v19 }
 0x401   :  { %v1332_v45 = vmax.f32 %v1326_v42, 0.0  ;;  %v1329_v1 = vadd.f32 %v1440_v7, %v1288_v22 }
 0x403   :  { %1334 = vst [vmem:[%s2207_s8] sm:$0xff] %v1332_v45  ;;  %v1333_v48 = vmax.f32 %v1329_v1, 0.0 }
 0x405   :  { %1335 = vst [vmem:[%s2207_s8 + $0x8] sm:$0xff] %v1333_v48 }

</bundles_post_ra>
